<compile_context>
chip_gen: v7x
topology: tpu7x:2x2x1
jax: 0.10.0
libtpu: 0.0.40
codegen_flags: <defaults>
</compile_context>

<pallas_src>
import jax
import jax.numpy as jnp
from jax.experimental import pallas as pl
from jax.experimental.pallas import tpu as pltpu


def qnet_kernel(x_ref, w1_ref, b1_ref, w2_ref, b2_ref, o_ref):
    # fc1: bf16 MXU matmul with f32 accumulation; bias + ReLU on the VPU in f32.
    h = jnp.dot(x_ref[...], w1_ref[...], preferred_element_type=jnp.float32)
    h = jnp.maximum(h + b1_ref[...], 0.0)
    # fc2: cast activations back to bf16 for the MXU, accumulate in f32.
    out = jnp.dot(h.astype(jnp.bfloat16), w2_ref[...],
                  preferred_element_type=jnp.float32)
    o_ref[...] = (out + b2_ref[...]).astype(o_ref.dtype)


def _round_up(n, m):
    return ((n + m - 1) // m) * m


def qnet_forward(x, w1, b1, w2, b2, *, block_b=256):
    """Fused QNet forward. x: (B, in); w1: (in, hid); w2: (hid, out); biases (1, N)."""
    B, in_size = x.shape
    hidden = w1.shape[1]
    out_size = w2.shape[1]

    # bf16 MXU inputs; biases stay f32.
    w1b = w1.astype(jnp.bfloat16)
    w2b = w2.astype(jnp.bfloat16)
    b1f = b1.astype(jnp.float32).reshape(1, hidden)
    b2f = b2.astype(jnp.float32).reshape(1, out_size)

    # Batch tile: multiple of 8 sublanes; pad the batch up to a multiple of the tile.
    tb = min(block_b, _round_up(B, 8))
    padded_b = _round_up(B, tb)
    xb = x.astype(jnp.bfloat16)
    if padded_b != B:
        xb = jnp.pad(xb, ((0, padded_b - B), (0, 0)))
    num_tiles = padded_b // tb

    # Advisory cost hint for XLA scheduling around the custom call.
    flops = 2 * padded_b * (in_size * hidden + hidden * out_size)
    bytes_accessed = (
        padded_b * in_size * 2                      # x (bf16)
        + in_size * hidden * 2 + hidden * out_size * 2   # weights (bf16)
        + (hidden + out_size) * 4                   # biases (f32)
        + padded_b * out_size * 4                   # output (f32)
    )
    cost = pl.CostEstimate(flops=flops, transcendentals=0,
                           bytes_accessed=bytes_accessed)

    # VMEM budget: resident weights + double-buffered x/out tiles (+ margin),
    # clamped to a limit that is safe on v5e/v6e/v7x.
    vmem_needed = (
        in_size * hidden * 2 + hidden * out_size * 2 + (hidden + out_size) * 4
        + 2 * tb * in_size * 2 + 2 * tb * out_size * 4
    )
    vmem_limit = int(min(max(4 * vmem_needed, 8 * 1024 * 1024), 32 * 1024 * 1024))

    out_padded = pl.pallas_call(
        qnet_kernel,
        out_shape=jax.ShapeDtypeStruct((padded_b, out_size), jnp.float32),
        grid=(num_tiles,),
        in_specs=[
            # x: one batch tile per grid step (double-buffered by the pipeline).
            pl.BlockSpec((tb, in_size), lambda i: (i, 0), memory_space=pltpu.VMEM),
            # Weights/biases: constant block index -> stay resident in VMEM.
            pl.BlockSpec((in_size, hidden), lambda i: (0, 0), memory_space=pltpu.VMEM),
            pl.BlockSpec((1, hidden), lambda i: (0, 0), memory_space=pltpu.VMEM),
            pl.BlockSpec((hidden, out_size), lambda i: (0, 0), memory_space=pltpu.VMEM),
            pl.BlockSpec((1, out_size), lambda i: (0, 0), memory_space=pltpu.VMEM),
        ],
        out_specs=pl.BlockSpec((tb, out_size), lambda i: (i, 0),
                               memory_space=pltpu.VMEM),
        compiler_params=pltpu.CompilerParams(
            dimension_semantics=("parallel",),      # megacore sharding on v7x
            vmem_limit_bytes=vmem_limit,
        ),
        cost_estimate=cost,
    )(xb, w1b, b1f, w2b, b2f)

    return out_padded[:B] if padded_b != B else out_padded


def init_linear_params(key, in_features, out_features, dtype=jnp.float32):
    # Matches PyTorch nn.Linear default init: U(-1/sqrt(fan_in), 1/sqrt(fan_in)).
    kw, kb = jax.random.split(key)
    bound = 1.0 / jnp.sqrt(jnp.asarray(in_features, dtype))
    # Stored as (in, out) so the kernel computes x @ W.
    w = jax.random.uniform(kw, (in_features, out_features), dtype, -bound, bound)
    b = jax.random.uniform(kb, (1, out_features), dtype, -bound, bound)
    return w, b


if __name__ == "__main__":
    # Shapes consistent with the module (input_size == output_size == length_train,
    # hidden_size = 256); batch is large enough to exercise the batch-tiled grid.
    batch = 512
    input_size = 128
    hidden_size = 256
    output_size = 128

    key = jax.random.PRNGKey(0)
    kx, k1, k2 = jax.random.split(key, 3)

    x = jax.random.normal(kx, (batch, input_size), jnp.float32)
    w1, b1 = init_linear_params(k1, input_size, hidden_size)
    w2, b2 = init_linear_params(k2, hidden_size, output_size)

    out = qnet_forward(x, w1, b1, w2, b2, block_b=256)
    jax.block_until_ready(out)

    # Reference with the same bf16-input / f32-accumulate semantics as the kernel.
    xb = x.astype(jnp.bfloat16)
    w1b = w1.astype(jnp.bfloat16)
    w2b = w2.astype(jnp.bfloat16)
    h_ref = jnp.maximum(
        jnp.dot(xb, w1b, preferred_element_type=jnp.float32) + b1, 0.0)
    ref = jnp.dot(h_ref.astype(jnp.bfloat16), w2b,
                  preferred_element_type=jnp.float32) + b2

    assert out.shape == (batch, output_size)
    assert jnp.allclose(out, ref, atol=2e-2, rtol=2e-2), \
        float(jnp.max(jnp.abs(out - ref)))

    print("KERNEL_OK")
</pallas_src>

<mosaic_0001>
module attributes {stable_mosaic.version = 11 : i64} {
  func.func @qnet_kernel(%arg0: i32, %arg1: memref<256x128xbf16, #tpu.memory_space<vmem>>, %arg2: memref<128x256xbf16, #tpu.memory_space<vmem>>, %arg3: memref<1x256xf32, #tpu.memory_space<vmem>>, %arg4: memref<256x128xbf16, #tpu.memory_space<vmem>>, %arg5: memref<1x128xf32, #tpu.memory_space<vmem>>, %arg6: memref<256x128xf32, #tpu.memory_space<vmem>>) attributes {dimension_semantics = [#tpu.dimension_semantics<parallel>], iteration_bounds = array<i64: 2>, scalar_prefetch = 0 : i64, scratch_operands = 0 : i64, tpu.core_type = #tpu.core_type<tc>, window_params = [{transform_indices = @transform_0, window_bounds = array<i64: 256, 128>}, {pipeline_mode = #tpu.pipeline_mode<synchronous>, transform_indices = @transform_1, window_bounds = array<i64: 128, 256>}, {pipeline_mode = #tpu.pipeline_mode<synchronous>, transform_indices = @transform_2, window_bounds = array<i64: 1, 256>}, {pipeline_mode = #tpu.pipeline_mode<synchronous>, transform_indices = @transform_3, window_bounds = array<i64: 256, 128>}, {pipeline_mode = #tpu.pipeline_mode<synchronous>, transform_indices = @transform_4, window_bounds = array<i64: 1, 128>}, {transform_indices = @transform_5, window_bounds = array<i64: 256, 128>}]} {
    %c0 = arith.constant 0 : index
    %c0_0 = arith.constant 0 : index
    %0 = vector.load %arg1[%c0, %c0_0] : memref<256x128xbf16, #tpu.memory_space<vmem>>, vector<256x128xbf16>
    %c0_1 = arith.constant 0 : index
    %c0_2 = arith.constant 0 : index
    %1 = vector.load %arg2[%c0_1, %c0_2] : memref<128x256xbf16, #tpu.memory_space<vmem>>, vector<128x256xbf16>
    %cst = arith.constant dense<0.000000e+00> : vector<256x256xf32>
    %2 = tpu.matmul %0, %1, %cst {dimension_numbers = #tpu.dot_dimension_numbers<[1], [0], [0], [1], [0, 0, 1, 1], [], []>} : vector<256x128xbf16>, vector<128x256xbf16>, vector<256x256xf32> -> vector<256x256xf32>
    %c0_3 = arith.constant 0 : index
    %c0_4 = arith.constant 0 : index
    %3 = vector.load %arg3[%c0_3, %c0_4] : memref<1x256xf32, #tpu.memory_space<vmem>>, vector<1x256xf32>
    %4 = vector.broadcast %3 : vector<1x256xf32> to vector<256x256xf32>
    %5 = arith.addf %2, %4 : vector<256x256xf32>
    %cst_5 = arith.constant 0.000000e+00 : f32
    %6 = vector.broadcast %cst_5 : f32 to vector<256x256xf32>
    %7 = arith.maximumf %5, %6 : vector<256x256xf32>
    %8 = arith.truncf %7 : vector<256x256xf32> to vector<256x256xbf16>
    %c0_6 = arith.constant 0 : index
    %c0_7 = arith.constant 0 : index
    %9 = vector.load %arg4[%c0_6, %c0_7] : memref<256x128xbf16, #tpu.memory_space<vmem>>, vector<256x128xbf16>
    %cst_8 = arith.constant dense<0.000000e+00> : vector<256x128xf32>
    %10 = tpu.matmul %8, %9, %cst_8 {dimension_numbers = #tpu.dot_dimension_numbers<[1], [0], [0], [1], [0, 0, 1, 1], [], []>} : vector<256x256xbf16>, vector<256x128xbf16>, vector<256x128xf32> -> vector<256x128xf32>
    %c0_9 = arith.constant 0 : index
    %c0_10 = arith.constant 0 : index
    %11 = vector.load %arg5[%c0_9, %c0_10] : memref<1x128xf32, #tpu.memory_space<vmem>>, vector<1x128xf32>
    %12 = vector.broadcast %11 : vector<1x128xf32> to vector<256x128xf32>
    %13 = arith.addf %10, %12 : vector<256x128xf32>
    %c0_11 = arith.constant 0 : index
    %c0_12 = arith.constant 0 : index
    %14 = vector.load %arg6[%c0_11, %c0_12] : memref<256x128xf32, #tpu.memory_space<vmem>>, vector<256x128xf32>
    tpu.vector_store %arg6[%c0_11, %c0_12], %13 {strides = array<i32>} : memref<256x128xf32, #tpu.memory_space<vmem>>, vector<256x128xf32>,
    return
  }
  func.func @transform_0(%arg0: i32) -> (i32, i32) {
    %c0_i32 = arith.constant 0 : i32
    %c0_i32_0 = arith.constant 0 : i32
    return %arg0, %c0_i32 : i32, i32
  }
  func.func @transform_1(%arg0: i32) -> (i32, i32) {
    %c0_i32 = arith.constant 0 : i32
    %c0_i32_0 = arith.constant 0 : i32
    %c0_i32_1 = arith.constant 0 : i32
    return %c0_i32, %c0_i32_0 : i32, i32
  }
  func.func @transform_2(%arg0: i32) -> (i32, i32) {
    %c0_i32 = arith.constant 0 : i32
    %c0_i32_0 = arith.constant 0 : i32
    %c0_i32_1 = arith.constant 0 : i32
    return %c0_i32, %c0_i32_0 : i32, i32
  }
  func.func @transform_3(%arg0: i32) -> (i32, i32) {
    %c0_i32 = arith.constant 0 : i32
    %c0_i32_0 = arith.constant 0 : i32
    %c0_i32_1 = arith.constant 0 : i32
    return %c0_i32, %c0_i32_0 : i32, i32
  }
  func.func @transform_4(%arg0: i32) -> (i32, i32) {
    %c0_i32 = arith.constant 0 : i32
    %c0_i32_0 = arith.constant 0 : i32
    %c0_i32_1 = arith.constant 0 : i32
    return %c0_i32, %c0_i32_0 : i32, i32
  }
  func.func @transform_5(%arg0: i32) -> (i32, i32) {
    %c0_i32 = arith.constant 0 : i32
    %c0_i32_0 = arith.constant 0 : i32
    return %arg0, %c0_i32 : i32, i32
  }
}

</mosaic_0001>

<bundles_post_ra>
// kernel: tpu_custom_call.1
= control target key start
LH: loop header
LB: loop body
LE: loop exit
PB: predicated region body
PF: predicated region fallthrough
CT: control target
= control target key end

     0   :  { %10 = vsyncpa [#allocation3], 0  ;;  %s2162_s0 = inlined_call_operand.hbm [shape: bf16[512,128], index: 0, kind: input, shape index: {}]   ;;  %s2163_s1 = inlined_call_operand.hbm [shape: bf16[128,256], index: 1, kind: input, shape index: {}]   ;;  %s2164_s2 = inlined_call_operand.vmem [shape: f32[1,256], index: 2, kind: input, shape index: {}]   ;;  %s2165_s3 = inlined_call_operand.hbm [shape: bf16[256,128], index: 3, kind: input, shape index: {}]   ;;  %s2166_s4 = inlined_call_operand.vmem [shape: f32[1,128], index: 4, kind: input, shape index: {}]   ;;  %s2167_s5 = inlined_call_operand.hbm [shape: f32[512,128], index: 5, kind: output, shape index: {}]  }
   0x1   :  { %12 = vsyncpa [#allocation3 + $0x1], 0 }
   0x2   :  { %13 = vsyncpa [#allocation6], 0 }
   0x3   :  { %14 = vsyncpa [#allocation4], 0 }
   0x4   :  { %16 = vsyncpa [#allocation4 + $0x1], 0  ;;  %s1744_s18 = smov 0   ;;  %s1746_s19 = smov 0  }
   0x5   :  { %s1748_s20 = smov 0   ;;  %s1750_s21 = smov 0  }
   0x6 LB: > { %s1765_s22 = sadd.s32 4294967295, %s1701_s21   ;;  %s1234_s23 = sadd.s32 4294967294, %s1701_s21   ;;  %s1701_s21 = sphi %s1750_s21, %s2187_s21   ;;  %s1697_s20 = sphi %s1748_s20, %s2186_s20   ;;  %s1693_s19 = sphi %s1746_s19, %s2185_s19   ;;  %s1689_s18 = sphi %s1744_s18, %s2184_s18  }
   0x7   : > { %p42_p0 = scmp.ne.s32.totalorder %s1693_s19, %s1689_s18  ;;  %p2168_p1 = scmp.eq.s32.totalorder %s1765_s22, 0 }
   0x8   : > { %p156_p3 = scmp.eq.s32.totalorder %s1234_s23, 1  ;;  %p1235_p5 = scmp.ge.s32.totalorder %s1701_s21, 1 }
   0x9   : > { %p1774_p4 = por %p2168_p1, %p42_p0  ;;  %p163_p7 = scmp.lt.s32.totalorder %s1701_s21, 3 }
   0xa   : > { %p1779_p6 = por %p156_p3, %p42_p0  ;;  %s1703_s27 = smov [#allocation5]  }
   0xb   : > { %s2171_s24 = scalar_select %p1774_p4, 1, 0 }
   0xc   : > { %s2172_s25 = scalar_select %p1779_p6, 1, 0 }
   0xd   : > { %p1784_p8 = pnand %p1235_p5, %p163_p7  ;;  %s175_s28 = sshll.u32 %s1703_s27, 4  ;;  %s1788_s28 = int_to_ptr.vmem [resolvable:$true] %s175_s28 }
   0xe   : > { %s1704_s30 = smov [#allocation7]   ;;  %s1545_s9 = scalar_lea.hbm %s2163_s1, 2048 }
   0xf   : > { %p1427_p9 = pneg %p1784_p8  ;;  %s191_s6 = sshll.u32 %s1704_s30, 4  ;;  %s1799_s6 = int_to_ptr.vmem [resolvable:$true] %s191_s6 }
  0x10   : > { %p1546_p12 = scmp.ne.s32.totalorder %s2163_s1, %s1545_s9  ;;  %p1552_p5 = scmp.lt.u32.totalorder %s1545_s9, %s2163_s1 }
  0x11   : > { %p1795_p11 = pnand %p1427_p9, %p2168_p1 }
  0x13   : > { %p1547_p13 = pneg %p1795_p11 }
  0x15   : > { %p1548_p0 = pnand %p1547_p13, %p1546_p12 }
  0x17   : > { %p1549_p3 = pneg %p1548_p0 }
  0x19   : > { %p1554_p7 = pnand %p1552_p5, %p1549_p3 }
  0x1b   : > { %1557 = shalt.err (!%p1554_p7)
}
  0x1c   : > { %s1558_s14 = scalar_lea.vmem %s1788_s28, 2048  ;;  %p1566_p2 = scmp.lt.s32.totalorder %s1788_s28, %s1788_s28 }
  0x1d   : > { %p1559_p9 = scmp.ne.s32.totalorder %s1788_s28, %s1558_s14  ;;  %p1567_p12 = scmp.lt.s32.totalorder %s1558_s14, %s1558_s14 }
  0x1f   : > { %p1561_p10 = pnand %p1559_p9, %p1547_p13  ;;  %p1568_p0 = por %p1567_p12, %p1566_p2 }
  0x21   : > { %p1562_p1 = pneg %p1561_p10 }
  0x23   : > { %p1569_p6 = pnand %p1568_p0, %p1562_p1 }
  0x25   : > { %1572 = shalt.err (!%p1569_p6)
}
  0x26   : > { %s1705_s15 = smov 128   ;;  %s1706_s16 = smov 8  }
  0x27   : > { %1430 = dma.hbm_to_vmem [thread:$0]  (!%p1795_p11), %s2163_s1, 2048, %s1788_s28, [#allocation6], %s1705_s15, %s1705_s15, %s1706_s16  }
  0x28   : > { %s1573_s7 = scalar_lea.hbm %s2165_s3, 2048 }
  0x29   : > { %p1574_p2 = scmp.ne.s32.totalorder %s2165_s3, %s1573_s7  ;;  %p1580_p10 = scmp.lt.u32.totalorder %s1573_s7, %s2165_s3 }
  0x2b   : > { %p1576_p1 = pnand %p1574_p2, %p1547_p13 }
  0x2d   : > { %p1577_p6 = pneg %p1576_p1 }
  0x2f   : > { %p1582_p3 = pnand %p1580_p10, %p1577_p6 }
  0x31   : > { %1585 = shalt.err (!%p1582_p3)
}
  0x32   : > { %s1586_s28 = scalar_lea.vmem %s1799_s6, 2048  ;;  %p1594_p12 = scmp.lt.s32.totalorder %s1799_s6, %s1799_s6 }
  0x33   : > { %p1587_p5 = scmp.ne.s32.totalorder %s1799_s6, %s1586_s28  ;;  %p1595_p0 = scmp.lt.s32.totalorder %s1586_s28, %s1586_s28 }
  0x35   : > { %p1589_p7 = pnand %p1587_p5, %p1547_p13  ;;  %p1596_p2 = por %p1595_p0, %p1594_p12 }
  0x37   : > { %p1590_p9 = pneg %p1589_p7 }
  0x39   : > { %p1597_p1 = pnand %p1596_p2, %p1590_p9 }
  0x3b   : > { %1600 = shalt.err (!%p1597_p1)
}
  0x3c   : > { %s1707_s12 = smov 64   ;;  %s1708_s13 = smov 4  }
  0x3d   : > { %1433 = dma.hbm_to_vmem [thread:$0]  (!%p1795_p11), %s2165_s3, 2048, %s1799_s6, [#allocation6], %s1707_s12, %s1707_s12, %s1708_s13  }
  0x3e   : > { %s1857_s16 = sadd.s32 1, %s1701_s21   ;;  %s29_s23 = sadd.s32 1, %s1697_s20 }
  0x3f   : > { %s26_s17 = ssub.s32 %s1701_s21, %s1857_s16  ;;  %p36_p6 = scmp.ne.s32.totalorder %s1697_s20, %s1693_s19 }
  0x40   : > { %p27_p13 = scmp.eq.s32.totalorder %s26_s17, 0  ;;  %p37_p10 = scmp.eq.s32.totalorder %s1701_s21, 0 }
  0x41   : > { %p2175_p5 = scmp.eq.s32.totalorder %s1765_s22, 1  ;;  %p1444_p9 = scmp.lt.s32.totalorder %s1701_s21, 2 }
  0x42   : > { %s1866_s27 = scalar_select %p27_p13, %s1697_s20, %s29_s23  }
  0x43   : > { %p38_p3 = por %p37_p10, %p36_p6  ;;  %p1870_p7 = por %p2175_p5, %p36_p6 }
  0x44   : > { %s208_s30 = sand.u32 1, %s1697_s20   ;;  %s1301_s6 = sshll.u32 %s1701_s21, 11 }
  0x45   : > { %s2176_s29 = scalar_select %p1870_p7, 1, 0 }
  0x46   : > { %s1239_s7 = sshll.u32 %s208_s30, 7  ;;  %s1880_s10 = scalar_lea.hbm %s2162_s0, %s1301_s6 }
  0x47   : > { %s212_s11 = scalar_lea.vmem [#allocation2], %s1239_s7  ;;  %p1884_p11 = pnand %p1444_p9, %p38_p3 }
  0x48   : > { %s219_s28 = sshll.u32 %s212_s11, 4  ;;  %s1888_s15 = scalar_lea.sflag [#allocation3], %s208_s30  ;;  %s1882_s28 = int_to_ptr.vmem [resolvable:$true] %s219_s28 }
  0x49   : > { %s1601_s17 = scalar_lea.hbm %s1880_s10, 2048  ;;  %p1603_p0 = pneg %p1884_p11 }
  0x4a   : > { %p1602_p12 = scmp.ne.s32.totalorder %s1880_s10, %s1601_s17  ;;  %s1606_s6 = scalar_lea.hbm %s2162_s0, 4096 }
  0x4b   : > { %p1607_p13 = scmp.lt.u32.totalorder %s1880_s10, %s2162_s0  ;;  %p1608_p6 = scmp.lt.u32.totalorder %s1606_s6, %s1601_s17 }
  0x4c   : > { %p1604_p2 = pnand %p1603_p0, %p1602_p12  ;;  %p1610_p3 = scmp.lt.u32.totalorder %s1601_s17, %s1880_s10 }
  0x4d   : > { %p1609_p10 = por %p1608_p6, %p1607_p13 }
  0x4e   : > { %p1605_p1 = pneg %p1604_p2 }
  0x4f   : > { %p1611_p5 = por %p1610_p3, %p1609_p10 }
  0x51   : > { %p1612_p9 = pnand %p1611_p5, %p1605_p1 }
  0x53   : > { %1615 = shalt.err (!%p1612_p9)
}
  0x54   : > { %s1616_s30 = scalar_lea.vmem %s1882_s28, 2048  ;;  %s1709_s11 = smov [#allocation2]  }
  0x55   : > { %p1617_p12 = scmp.ne.s32.totalorder %s1882_s28, %s1616_s30  ;;  %s1621_s23 = sshll.u32 %s1709_s11, 4  ;;  %s1622_s23 = int_to_ptr.vmem [resolvable:$false] %s1621_s23 }
  0x56   : > { %s1623_s7 = scalar_lea.vmem %s1622_s23, 4096  ;;  %p1624_p4 = scmp.lt.s32.totalorder %s1882_s28, %s1622_s23 }
  0x57   : > { %p1619_p2 = pnand %p1617_p12, %p1603_p0  ;;  %p1625_p13 = scmp.lt.s32.totalorder %s1623_s7, %s1616_s30 }
  0x59   : > { %p1620_p7 = pneg %p1619_p2  ;;  %p1626_p6 = por %p1625_p13, %p1624_p4 }
  0x5b   : > { %p1627_p10 = pnand %p1626_p6, %p1620_p7 }
  0x5d   : > { %1630 = shalt.err (!%p1627_p10)
}
  0x5e   : > { %1437 = dma.hbm_to_vmem [thread:$0]  (!%p1884_p11), %s1880_s10, 2048, %s1882_s28, %s1888_s15, %s1707_s12, %s1707_s12, %s1708_s13  }
  0x5f   : > { %231 = sbr.rel (%p1784_p8) target bundleno = 715 (0x2cb), region = 40  ;;  %s1922_s17 = sand.u32 (!%p1784_p8), 1, %s1693_s19  }
  0x60   : > { %s1243_s6 = sshll.u32 (!%p1784_p8), %s1922_s17, 7  ;;  %s234_s8 = scalar_lea.sflag (!%p1784_p8), [#allocation3], %s1922_s17 }
  0x61   : > { %s1926_s9 = scalar_lea.vmem (!%p1784_p8), [#allocation2], %s1243_s6  ;;  %p2178_p4 = scmp.ne.s32.totalorder (!%p1784_p8), %s2171_s24, 0 }
  0x66   : > { %1676 = dma.done.wait (%p2178_p4), %s234_s8, 2048  }
  0x67   : > { %1678 = vsyncadd (%p2178_p4), %s234_s8, 4294965248  ;;  %p2179_p7 = scmp.eq.s32.totalorder %s1765_s22, 0 }
  0x69   : > { %1680 = dma.done.wait (%p2179_p7), [#allocation6], 4096   ;;  %p2180_p8 = pmov %p2179_p7 }
  0x6a   : > { %v1710_v0 = vmov 0   ;;  %v1489_v1 = vld [vmem:[#allocation5 + $0x4] ss:$8 sps:$4 sm:$0xff]   ;;  %v1491_v2 = vld [vmem:[#allocation5] ss:$8 sps:$4 sm:$0xff]   ;;  %v1533_v22 = vld [vmem:[#allocation7 + $0x50] sm:$0xff]   ;;  %v325_v49 = vlaneseq }
  0x6b   : > { %1682 = vsyncadd (%p2180_p8), [#allocation6], 4294963200  ;;  %543 = vmatprep.mubr.bf16.mxu0 %v1710_v0  ;;  %511 = vmatprep.subr.bf16.mxu0 %v1489_v1  ;;  %v1492_v3 = vld [vmem:[#allocation5 + $0x14] ss:$8 sps:$4 sm:$0xff]   ;;  %v1494_v4 = vld [vmem:[#allocation5 + $0x10] ss:$8 sps:$4 sm:$0xff]  }
  0x6c   : > { %512 = vmatpush1.bf16.msra.mxu0 %v1491_v2  ;;  %v1495_v5 = vld [vmem:[#allocation5 + $0x24] ss:$8 sps:$4 sm:$0xff]   ;;  %v1497_v6 = vld [vmem:[#allocation5 + $0x20] ss:$8 sps:$4 sm:$0xff]   ;;  %v1498_v7 = vld [vmem:[#allocation5 + $0x34] ss:$8 sps:$4 sm:$0xff]  }
  0x6d   : > { %513 = vmatprep.subr.bf16.mxu0 %v1492_v3  ;;  %v1500_v8 = vld [vmem:[#allocation5 + $0x30] ss:$8 sps:$4 sm:$0xff]   ;;  %v1501_v9 = vld [vmem:[#allocation5 + $0x44] ss:$8 sps:$4 sm:$0xff]   ;;  %v1503_v10 = vld [vmem:[#allocation5 + $0x40] ss:$8 sps:$4 sm:$0xff]  }
  0x6e   : > { %v1504_v11 = vld [vmem:[#allocation5 + $0x54] ss:$8 sps:$4 sm:$0xff]   ;;  %v1506_v12 = vld [vmem:[#allocation5 + $0x50] ss:$8 sps:$4 sm:$0xff]   ;;  %v1507_v13 = vld [vmem:[#allocation5 + $0x64] ss:$8 sps:$4 sm:$0xff]  }
  0x6f   : > { %v1509_v14 = vld [vmem:[#allocation5 + $0x60] ss:$8 sps:$4 sm:$0xff]   ;;  %v1510_v15 = vld [vmem:[#allocation5 + $0x74] ss:$8 sps:$4 sm:$0xff]   ;;  %v1512_v16 = vld [vmem:[#allocation5 + $0x70] ss:$8 sps:$4 sm:$0xff]  }
  0x70   : > { %514 = vmatpush1.bf16.msra.mxu0 %v1494_v4  ;;  %v1529_v17 = vld [vmem:[#allocation7 + $0x40] sm:$0xff]   ;;  %v1531_v20 = vld [vmem:[#allocation7 + $0x48] sm:$0xff]   ;;  %v1534_v23 = vld [vmem:[#allocation7 + $0x10] sm:$0xff]   ;;  %v326_v50 = vshrl.u32 %v325_v49, 7  ;;  %s1246_s12 = sshll.u32 %s1922_s17, 8  ;;  %s1302_s14 = sshll.u32 %s1765_s22, 12 }
  0x71   : > { %515 = vmatprep.subr.bf16.mxu0 %v1495_v5  ;;  %v1513_v18 = vld [vmem:[%s1926_s9] sm:$0xff]   ;;  %1303 = vmatprep.subr.bf16.mxu1 %v1529_v17  ;;  %v1532_v21 = vld [vmem:[#allocation7 + $0x8] sm:$0xff]   ;;  %v1535_v24 = vld [vmem:[#allocation7 + $0x58] sm:$0xff]   ;;  %s2046_s28 = scalar_lea.vmem [#allocation8], %s1246_s12  ;;  %s2113_s23 = scalar_lea.hbm %s2167_s5, %s1302_s14 }
  0x72   : > { %v1530_v19 = vld [vmem:[#allocation7] sm:$0xff]   ;;  %v1514_v25 = vld [vmem:[%s1926_s9 + $0x8] sm:$0xff]   ;;  %v1536_v26 = vld [vmem:[#allocation7 + $0x18] sm:$0xff]   ;;  %v327_v51 = vsub.s32 0, %v326_v50  ;;  %v331_v53 = vsub.s32 1, %v326_v50  ;;  %s1142_s15 = sshll.u32 %s2046_s28, 4  ;;  %s2115_s15 = int_to_ptr.vmem [resolvable:$true] %s1142_s15 }
  0x73   : > { %1304 = vmatpush3.bf16.msra.mxu1 %v1530_v19  ;;  %v1537_v27 = vld [vmem:[#allocation7 + $0x60] sm:$0xff]   ;;  %v1539_v29 = vld [vmem:[#allocation7 + $0x68] sm:$0xff]   ;;  %v1515_v30 = vld [vmem:[%s1926_s9 + $0x10] sm:$0xff]   ;;  %s1129_s22 = scalar_lea.sflag [#allocation4], %s1922_s17  ;;  %s1631_s7 = scalar_lea.vmem %s2115_s15, 4096 }
  0x74   : > { %516 = vmatpush1.bf16.msra.mxu0 %v1497_v6  ;;  %1305 = vmatprep.subr.bf16.mxu1 %v1531_v20  ;;  %v1538_v28 = vld [vmem:[#allocation7 + $0x20] sm:$0xff]   ;;  %v1516_v31 = vld [vmem:[%s1926_s9 + $0x18] sm:$0xff]   ;;  %v1518_v33 = vld [vmem:[%s1926_s9 + $0x28] sm:$0xff]   ;;  %p1632_p11 = scmp.ne.s32.totalorder %s2115_s15, %s1631_s7  ;;  %p2181_p0 = scmp.ne.s32.totalorder %s2176_s29, 0 }
  0x75   : > { %517 = vmatprep.subr.bf16.mxu0 %v1498_v7  ;;  %v1517_v32 = vld [vmem:[%s1926_s9 + $0x20] sm:$0xff]   ;;  %v1519_v34 = vld [vmem:[%s1926_s9 + $0x30] sm:$0xff]   ;;  %v1520_v35 = vld [vmem:[%s1926_s9 + $0x38] sm:$0xff]   ;;  %s1711_s6 = smov [#allocation8]  }
  0x76   : > { %v1521_v36 = vld [vmem:[%s1926_s9 + $0x40] sm:$0xff]   ;;  %v1522_v37 = vld [vmem:[%s1926_s9 + $0x48] sm:$0xff]   ;;  %v1523_v38 = vld [vmem:[%s1926_s9 + $0x50] sm:$0xff]   ;;  %p1633_p1 = pnand %p1632_p11, %p2181_p0  ;;  %s1635_s8 = sshll.u32 %s1711_s6, 4  ;;  %s1636_s8 = int_to_ptr.vmem [resolvable:$false] %s1635_s8 }
  0x77   : > { %1306 = vmatpush3.bf16.msra.mxu1 %v1532_v21  ;;  %v1540_v39 = vld [vmem:[#allocation7 + $0x28] sm:$0xff]   ;;  %v1524_v40 = vld [vmem:[%s1926_s9 + $0x58] sm:$0xff]   ;;  %v1541_v41 = vld [vmem:[#allocation7 + $0x70] sm:$0xff]   ;;  %p1638_p5 = scmp.lt.s32.totalorder %s2115_s15, %s1636_s8 }
  0x78   : > { %518 = vmatpush1.bf16.msra.mxu0 %v1500_v8  ;;  %1307 = vmatprep.subr.bf16.mxu1 %v1533_v22  ;;  %v1542_v42 = vld [vmem:[#allocation7 + $0x30] sm:$0xff]   ;;  %v1543_v43 = vld [vmem:[#allocation7 + $0x78] sm:$0xff]   ;;  %v1525_v45 = vld [vmem:[%s1926_s9 + $0x60] sm:$0xff]   ;;  %p1634_p3 = pneg %p1633_p1 }
  0x79   : > { %519 = vmatprep.subr.bf16.mxu0 %v1501_v9  ;;  %v1544_v44 = vld [vmem:[#allocation7 + $0x38] sm:$0xff]   ;;  %v1526_v46 = vld [vmem:[%s1926_s9 + $0x68] sm:$0xff]   ;;  %v1527_v47 = vld [vmem:[%s1926_s9 + $0x70] sm:$0xff]  }
  0x7a   : > { %v1528_v48 = vld [vmem:[%s1926_s9 + $0x78] sm:$0xff]   ;;  %v323_v52 = vld [vmem:[%s2164_s2] sm:$0x3]  ;;  %s1637_s9 = scalar_lea.vmem %s1636_s8, 8192 }
  0x7b   : > { %1308 = vmatpush3.bf16.msra.mxu1 %v1534_v23  ;;  %v1971_v54 = vrot.slane %v323_v52, %v327_v51  ;;  %v1973_v55 = vrot.slane %v323_v52, %v331_v53  ;;  %p1639_p9 = scmp.lt.s32.totalorder %s1637_s9, %s1631_s7 }
  0x7c   : > { %520 = vmatpush1.bf16.msra.mxu0 %v1503_v10  ;;  %1309 = vmatprep.subr.bf16.mxu1 %v1535_v24 }
  0x7d   : > { %521 = vmatprep.subr.bf16.mxu0 %v1504_v11  ;;  %p1640_p12 = por %p1639_p9, %p1638_p5 }
  0x7f   : > { %1310 = vmatpush3.bf16.msra.mxu1 %v1536_v26  ;;  %p1641_p2 = pnand %p1640_p12, %p1634_p3 }
  0x80   : > { %522 = vmatpush1.bf16.msra.mxu0 %v1506_v12  ;;  %1311 = vmatprep.subr.bf16.mxu1 %v1537_v27 }
  0x81   : > { %523 = vmatprep.subr.bf16.mxu0 %v1507_v13 }
  0x83   : > { %1312 = vmatpush3.bf16.msra.mxu1 %v1538_v28 }
  0x84   : > { %524 = vmatpush1.bf16.msra.mxu0 %v1509_v14  ;;  %1313 = vmatprep.subr.bf16.mxu1 %v1539_v29 }
  0x85   : > { %525 = vmatprep.subr.bf16.mxu0 %v1510_v15 }
  0x87   : > { %1314 = vmatpush3.bf16.msra.mxu1 %v1540_v39 }
  0x88   : > { %526 = vmatpush1.bf16.msra.mxu0 %v1512_v16  ;;  %1315 = vmatprep.subr.bf16.mxu1 %v1541_v41 }
  0x8b   : > { %544 = vmatmul.mubr.bf16.vlgmr.msra.gmra.mrb[0].mxu0 %v1513_v18  ;;  %1316 = vmatpush3.bf16.msra.mxu1 %v1542_v42 }
  0x8c   : > { %553 = vmatprep.mubr.bf16.mxu0 %v1710_v0  ;;  %1317 = vmatprep.subr.bf16.mxu1 %v1543_v43 }
  0x8f   : > { %1318 = vmatpush3.bf16.msra.mxu1 %v1544_v44 }
  0x93   : > { %554 = vmatmul.mubr.bf16.gmra.mrb[4].mxu0 %v1514_v25 }
  0x94   : > { %563 = vmatprep.mubr.bf16.mxu0 %v1710_v0 }
  0x9b   : > { %564 = vmatmul.mubr.bf16.gmra.mrb[8].mxu0 %v1515_v30 }
  0x9c   : > { %573 = vmatprep.mubr.bf16.mxu0 %v1710_v0 }
  0xa3   : > { %574 = vmatmul.mubr.bf16.gmra.mrb[12].mxu0 %v1516_v31 }
  0xa4   : > { %583 = vmatprep.mubr.bf16.mxu0 %v1710_v0 }
  0xab   : > { %584 = vmatmul.mubr.bf16.gmra.mrb[16].mxu0 %v1517_v32 }
  0xac   : > { %593 = vmatprep.mubr.bf16.mxu0 %v1710_v0 }
  0xb3   : > { %594 = vmatmul.mubr.bf16.gmra.mrb[20].mxu0 %v1518_v33 }
  0xb4   : > { %603 = vmatprep.mubr.bf16.mxu0 %v1710_v0 }
  0xbb   : > { %604 = vmatmul.mubr.bf16.gmra.mrb[24].mxu0 %v1519_v34 }
  0xbc   : > { %613 = vmatprep.mubr.bf16.mxu0 %v1710_v0 }
  0xc3   : > { %614 = vmatmul.mubr.bf16.gmra.mrb[28].mxu0 %v1520_v35 }
  0xc4   : > { %623 = vmatprep.mubr.bf16.mxu0 %v1710_v0 }
  0xcb   : > { %624 = vmatmul.mubr.bf16.gmra.mrb[32].mxu0 %v1521_v36 }
  0xcc   : > { %633 = vmatprep.mubr.bf16.mxu0 %v1710_v0 }
  0xd3   : > { %634 = vmatmul.mubr.bf16.gmra.mrb[36].mxu0 %v1522_v37 }
  0xd4   : > { %643 = vmatprep.mubr.bf16.mxu0 %v1710_v0 }
  0xdb   : > { %644 = vmatmul.mubr.bf16.gmra.mrb[40].mxu0 %v1523_v38 }
  0xdc   : > { %653 = vmatprep.mubr.bf16.mxu0 %v1710_v0 }
  0xe3   : > { %654 = vmatmul.mubr.bf16.gmra.mrb[44].mxu0 %v1524_v40 }
  0xe4   : > { %663 = vmatprep.mubr.bf16.mxu0 %v1710_v0 }
  0xeb   : > { %664 = vmatmul.mubr.bf16.gmra.mrb[48].mxu0 %v1525_v45 }
  0xec   : > { %673 = vmatprep.mubr.bf16.mxu0 %v1710_v0 }
  0xf3   : > { %674 = vmatmul.mubr.bf16.gmra.mrb[52].mxu0 %v1526_v46 }
  0xf4   : > { %683 = vmatprep.mubr.bf16.mxu0 %v1710_v0 }
  0xfb   : > { %684 = vmatmul.mubr.bf16.gmra.mrb[56].mxu0 %v1527_v47 }
  0xfc   : > { %693 = vmatprep.mubr.bf16.mxu0 %v1710_v0 }
 0x103   : > { %694 = vmatmul.mubr.bf16.gmra.mrb[60].mxu0 %v1528_v48 }
 0x15e   : > { %v545_v56 = vpop.f32.mrb[0].mxu0 }
 0x15f   : > { %v546_v57 = vadd.f32 %v545_v56, %v1971_v54  ;;  %v547_v58 = vpop.f32.mrb[1].mxu0 }
 0x160   : > { %v548_v59 = vadd.f32 %v547_v58, %v1973_v55  ;;  %v549_v60 = vpop.f32.mrb[2].mxu0 }
 0x161   : > { %v550_v61 = vadd.f32 %v549_v60, %v1971_v54  ;;  %v551_v62 = vpop.f32.mrb[3].mxu0  ;;  %v704_v0 = vmax.f32 %v546_v57, 0.0 }
 0x162   : > { %v552_v63 = vadd.f32 %v551_v62, %v1973_v55  ;;  %v705_v2 = vmax.f32 %v548_v59, 0.0 }
 0x163   : > { %v706_v1 = vmax.f32 %v550_v61, 0.0 }
 0x164   : > { %v707_v3 = vmax.f32 %v552_v63, 0.0 }
 0x165   : > { %v768_v4 = vpack.c.bf16 %v706_v1, %v704_v0 }
 0x166   : > { %v555_v5 = vpop.f32.mrb[4].mxu0  ;;  %v769_v6 = vpack.c.bf16 %v707_v3, %v705_v2 }
 0x167   : > { %v556_v7 = vadd.f32 %v555_v5, %v1971_v54  ;;  %v557_v8 = vpop.f32.mrb[5].mxu0 }
 0x168   : > { %v558_v9 = vadd.f32 %v557_v8, %v1973_v55  ;;  %v559_v10 = vpop.f32.mrb[6].mxu0  ;;  %967 = vmatprep.mubr.bf16.mxu1 %v769_v6 }
 0x169   : > { %v560_v11 = vadd.f32 %v559_v10, %v1971_v54  ;;  %v561_v12 = vpop.f32.mrb[7].mxu0  ;;  %968 = vmatmul.mubr.bf16.vlgmr.msra.gmra.mrb[0].mxu1 %v768_v4  ;;  %v708_v14 = vmax.f32 %v556_v7, 0.0 }
 0x16a   : > { %v562_v13 = vadd.f32 %v561_v12, %v1973_v55  ;;  %v709_v16 = vmax.f32 %v558_v9, 0.0 }
 0x16b   : > { %v710_v15 = vmax.f32 %v560_v11, 0.0 }
 0x16c   : > { %v711_v17 = vmax.f32 %v562_v13, 0.0 }
 0x16d   : > { %v770_v18 = vpack.c.bf16 %v710_v15, %v708_v14 }
 0x16e   : > { %v771_v19 = vpack.c.bf16 %v711_v17, %v709_v16  ;;  %v565_v20 = vpop.f32.mrb[8].mxu0 }
 0x16f   : > { %v566_v21 = vadd.f32 %v565_v20, %v1971_v54  ;;  %v567_v22 = vpop.f32.mrb[9].mxu0 }
 0x170   : > { %v568_v23 = vadd.f32 %v567_v22, %v1973_v55  ;;  %v569_v24 = vpop.f32.mrb[10].mxu0  ;;  %975 = vmatprep.mubr.bf16.mxu1 %v771_v19 }
 0x171   : > { %v570_v25 = vadd.f32 %v569_v24, %v1971_v54  ;;  %v571_v26 = vpop.f32.mrb[11].mxu0  ;;  %976 = vmatmul.mubr.bf16.gmra.mrb[4].mxu1 %v770_v18  ;;  %v712_v28 = vmax.f32 %v566_v21, 0.0 }
 0x172   : > { %v572_v27 = vadd.f32 %v571_v26, %v1973_v55  ;;  %v713_v30 = vmax.f32 %v568_v23, 0.0 }
 0x173   : > { %v714_v29 = vmax.f32 %v570_v25, 0.0 }
 0x174   : > { %v715_v31 = vmax.f32 %v572_v27, 0.0 }
 0x175   : > { %v772_v32 = vpack.c.bf16 %v714_v29, %v712_v28 }
 0x176   : > { %v773_v33 = vpack.c.bf16 %v715_v31, %v713_v30  ;;  %v575_v34 = vpop.f32.mrb[12].mxu0 }
 0x177   : > { %v576_v35 = vadd.f32 %v575_v34, %v1971_v54  ;;  %v577_v36 = vpop.f32.mrb[13].mxu0 }
 0x178   : > { %v578_v37 = vadd.f32 %v577_v36, %v1973_v55  ;;  %v579_v38 = vpop.f32.mrb[14].mxu0  ;;  %983 = vmatprep.mubr.bf16.mxu1 %v773_v33 }
 0x179   : > { %v580_v39 = vadd.f32 %v579_v38, %v1971_v54  ;;  %v581_v40 = vpop.f32.mrb[15].mxu0  ;;  %984 = vmatmul.mubr.bf16.gmra.mrb[8].mxu1 %v772_v32  ;;  %v716_v42 = vmax.f32 %v576_v35, 0.0 }
 0x17a   : > { %v582_v41 = vadd.f32 %v581_v40, %v1973_v55  ;;  %v717_v44 = vmax.f32 %v578_v37, 0.0 }
 0x17b   : > { %v718_v43 = vmax.f32 %v580_v39, 0.0 }
 0x17c   : > { %v719_v45 = vmax.f32 %v582_v41, 0.0 }
 0x17d   : > { %v774_v46 = vpack.c.bf16 %v718_v43, %v716_v42 }
 0x17e   : > { %v775_v47 = vpack.c.bf16 %v719_v45, %v717_v44  ;;  %v585_v48 = vpop.f32.mrb[16].mxu0 }
 0x17f   : > { %v586_v49 = vadd.f32 %v585_v48, %v1971_v54  ;;  %v587_v50 = vpop.f32.mrb[17].mxu0 }
 0x180   : > { %v588_v51 = vadd.f32 %v587_v50, %v1973_v55  ;;  %v589_v52 = vpop.f32.mrb[18].mxu0  ;;  %991 = vmatprep.mubr.bf16.mxu1 %v775_v47 }
 0x181   : > { %v590_v53 = vadd.f32 %v589_v52, %v1971_v54  ;;  %v591_v56 = vpop.f32.mrb[19].mxu0  ;;  %992 = vmatmul.mubr.bf16.gmra.mrb[12].mxu1 %v774_v46  ;;  %v720_v58 = vmax.f32 %v586_v49, 0.0 }
 0x182   : > { %v592_v57 = vadd.f32 %v591_v56, %v1973_v55  ;;  %v721_v60 = vmax.f32 %v588_v51, 0.0 }
 0x183   : > { %v722_v59 = vmax.f32 %v590_v53, 0.0 }
 0x184   : > { %v723_v61 = vmax.f32 %v592_v57, 0.0 }
 0x185   : > { %v776_v62 = vpack.c.bf16 %v722_v59, %v720_v58 }
 0x186   : > { %v777_v63 = vpack.c.bf16 %v723_v61, %v721_v60  ;;  %v595_v0 = vpop.f32.mrb[20].mxu0 }
 0x187   : > { %v596_v1 = vadd.f32 %v595_v0, %v1971_v54  ;;  %v597_v2 = vpop.f32.mrb[21].mxu0 }
 0x188   : > { %v598_v3 = vadd.f32 %v597_v2, %v1973_v55  ;;  %v599_v4 = vpop.f32.mrb[22].mxu0  ;;  %999 = vmatprep.mubr.bf16.mxu1 %v777_v63 }
 0x189   : > { %v600_v5 = vadd.f32 %v599_v4, %v1971_v54  ;;  %v601_v6 = vpop.f32.mrb[23].mxu0  ;;  %1000 = vmatmul.mubr.bf16.gmra.mrb[16].mxu1 %v776_v62  ;;  %v724_v8 = vmax.f32 %v596_v1, 0.0 }
 0x18a   : > { %v602_v7 = vadd.f32 %v601_v6, %v1973_v55  ;;  %v725_v10 = vmax.f32 %v598_v3, 0.0 }
 0x18b   : > { %v726_v9 = vmax.f32 %v600_v5, 0.0 }
 0x18c   : > { %v727_v11 = vmax.f32 %v602_v7, 0.0 }
 0x18d   : > { %v778_v12 = vpack.c.bf16 %v726_v9, %v724_v8 }
 0x18e   : > { %v779_v13 = vpack.c.bf16 %v727_v11, %v725_v10  ;;  %v605_v14 = vpop.f32.mrb[24].mxu0 }
 0x18f   : > { %v606_v15 = vadd.f32 %v605_v14, %v1971_v54  ;;  %v607_v16 = vpop.f32.mrb[25].mxu0 }
 0x190   : > { %v608_v17 = vadd.f32 %v607_v16, %v1973_v55  ;;  %v609_v18 = vpop.f32.mrb[26].mxu0  ;;  %1007 = vmatprep.mubr.bf16.mxu1 %v779_v13 }
 0x191   : > { %v610_v19 = vadd.f32 %v609_v18, %v1971_v54  ;;  %v611_v20 = vpop.f32.mrb[27].mxu0  ;;  %1008 = vmatmul.mubr.bf16.gmra.mrb[20].mxu1 %v778_v12  ;;  %v728_v22 = vmax.f32 %v606_v15, 0.0 }
 0x192   : > { %v612_v21 = vadd.f32 %v611_v20, %v1973_v55  ;;  %v729_v24 = vmax.f32 %v608_v17, 0.0 }
 0x193   : > { %v730_v23 = vmax.f32 %v610_v19, 0.0 }
 0x194   : > { %v731_v25 = vmax.f32 %v612_v21, 0.0 }
 0x195   : > { %v780_v26 = vpack.c.bf16 %v730_v23, %v728_v22 }
 0x196   : > { %v781_v27 = vpack.c.bf16 %v731_v25, %v729_v24  ;;  %v615_v28 = vpop.f32.mrb[28].mxu0 }
 0x197   : > { %v616_v29 = vadd.f32 %v615_v28, %v1971_v54  ;;  %v617_v30 = vpop.f32.mrb[29].mxu0 }
 0x198   : > { %v618_v31 = vadd.f32 %v617_v30, %v1973_v55  ;;  %v619_v32 = vpop.f32.mrb[30].mxu0  ;;  %1015 = vmatprep.mubr.bf16.mxu1 %v781_v27 }
 0x199   : > { %v620_v33 = vadd.f32 %v619_v32, %v1971_v54  ;;  %v621_v34 = vpop.f32.mrb[31].mxu0  ;;  %1016 = vmatmul.mubr.bf16.gmra.mrb[24].mxu1 %v780_v26  ;;  %v732_v36 = vmax.f32 %v616_v29, 0.0 }
 0x19a   : > { %v622_v35 = vadd.f32 %v621_v34, %v1973_v55  ;;  %v733_v38 = vmax.f32 %v618_v31, 0.0 }
 0x19b   : > { %v734_v37 = vmax.f32 %v620_v33, 0.0 }
 0x19c   : > { %v735_v39 = vmax.f32 %v622_v35, 0.0 }
 0x19d   : > { %v782_v40 = vpack.c.bf16 %v734_v37, %v732_v36 }
 0x19e   : > { %v783_v41 = vpack.c.bf16 %v735_v39, %v733_v38  ;;  %v625_v42 = vpop.f32.mrb[32].mxu0 }
 0x19f   : > { %v626_v43 = vadd.f32 %v625_v42, %v1971_v54  ;;  %v627_v44 = vpop.f32.mrb[33].mxu0 }
 0x1a0   : > { %v628_v45 = vadd.f32 %v627_v44, %v1973_v55  ;;  %v629_v46 = vpop.f32.mrb[34].mxu0  ;;  %1023 = vmatprep.mubr.bf16.mxu1 %v783_v41 }
 0x1a1   : > { %v630_v47 = vadd.f32 %v629_v46, %v1971_v54  ;;  %v631_v48 = vpop.f32.mrb[35].mxu0  ;;  %1024 = vmatmul.mubr.bf16.gmra.mrb[28].mxu1 %v782_v40  ;;  %v736_v50 = vmax.f32 %v626_v43, 0.0 }
 0x1a2   : > { %v632_v49 = vadd.f32 %v631_v48, %v1973_v55  ;;  %v737_v52 = vmax.f32 %v628_v45, 0.0 }
 0x1a3   : > { %v738_v51 = vmax.f32 %v630_v47, 0.0 }
 0x1a4   : > { %v739_v53 = vmax.f32 %v632_v49, 0.0 }
 0x1a5   : > { %v784_v56 = vpack.c.bf16 %v738_v51, %v736_v50 }
 0x1a6   : > { %v785_v57 = vpack.c.bf16 %v739_v53, %v737_v52  ;;  %v635_v58 = vpop.f32.mrb[36].mxu0 }
 0x1a7   : > { %v636_v59 = vadd.f32 %v635_v58, %v1971_v54  ;;  %v637_v60 = vpop.f32.mrb[37].mxu0 }
 0x1a8   : > { %v638_v61 = vadd.f32 %v637_v60, %v1973_v55  ;;  %v639_v62 = vpop.f32.mrb[38].mxu0  ;;  %1031 = vmatprep.mubr.bf16.mxu1 %v785_v57 }
 0x1a9   : > { %v640_v63 = vadd.f32 %v639_v62, %v1971_v54  ;;  %v641_v0 = vpop.f32.mrb[39].mxu0  ;;  %1032 = vmatmul.mubr.bf16.gmra.mrb[32].mxu1 %v784_v56  ;;  %v740_v2 = vmax.f32 %v636_v59, 0.0 }
 0x1aa   : > { %v642_v1 = vadd.f32 %v641_v0, %v1973_v55  ;;  %v741_v4 = vmax.f32 %v638_v61, 0.0 }
 0x1ab   : > { %v742_v3 = vmax.f32 %v640_v63, 0.0 }
 0x1ac   : > { %v743_v5 = vmax.f32 %v642_v1, 0.0 }
 0x1ad   : > { %v786_v6 = vpack.c.bf16 %v742_v3, %v740_v2 }
 0x1ae   : > { %v787_v7 = vpack.c.bf16 %v743_v5, %v741_v4  ;;  %v645_v8 = vpop.f32.mrb[40].mxu0 }
 0x1af   : > { %v646_v9 = vadd.f32 %v645_v8, %v1971_v54  ;;  %v647_v10 = vpop.f32.mrb[41].mxu0 }
 0x1b0   : > { %v648_v11 = vadd.f32 %v647_v10, %v1973_v55  ;;  %v649_v12 = vpop.f32.mrb[42].mxu0  ;;  %1039 = vmatprep.mubr.bf16.mxu1 %v787_v7 }
 0x1b1   : > { %v650_v13 = vadd.f32 %v649_v12, %v1971_v54  ;;  %v651_v14 = vpop.f32.mrb[43].mxu0  ;;  %1040 = vmatmul.mubr.bf16.gmra.mrb[36].mxu1 %v786_v6  ;;  %v744_v16 = vmax.f32 %v646_v9, 0.0 }
 0x1b2   : > { %v652_v15 = vadd.f32 %v651_v14, %v1973_v55  ;;  %v745_v18 = vmax.f32 %v648_v11, 0.0 }
 0x1b3   : > { %v746_v17 = vmax.f32 %v650_v13, 0.0 }
 0x1b4   : > { %v747_v19 = vmax.f32 %v652_v15, 0.0 }
 0x1b5   : > { %v788_v20 = vpack.c.bf16 %v746_v17, %v744_v16 }
 0x1b6   : > { %v789_v21 = vpack.c.bf16 %v747_v19, %v745_v18  ;;  %v655_v22 = vpop.f32.mrb[44].mxu0 }
 0x1b7   : > { %v656_v23 = vadd.f32 %v655_v22, %v1971_v54  ;;  %v657_v24 = vpop.f32.mrb[45].mxu0 }
 0x1b8   : > { %v658_v25 = vadd.f32 %v657_v24, %v1973_v55  ;;  %v659_v26 = vpop.f32.mrb[46].mxu0  ;;  %1047 = vmatprep.mubr.bf16.mxu1 %v789_v21 }
 0x1b9   : > { %v660_v27 = vadd.f32 %v659_v26, %v1971_v54  ;;  %v661_v28 = vpop.f32.mrb[47].mxu0  ;;  %1048 = vmatmul.mubr.bf16.gmra.mrb[40].mxu1 %v788_v20  ;;  %v748_v30 = vmax.f32 %v656_v23, 0.0 }
 0x1ba   : > { %v662_v29 = vadd.f32 %v661_v28, %v1973_v55  ;;  %v749_v32 = vmax.f32 %v658_v25, 0.0 }
 0x1bb   : > { %v750_v31 = vmax.f32 %v660_v27, 0.0 }
 0x1bc   : > { %v751_v33 = vmax.f32 %v662_v29, 0.0 }
 0x1bd   : > { %v790_v34 = vpack.c.bf16 %v750_v31, %v748_v30  ;;  %v2043_v31 = vld [vmem:[%s2166_s4] ss:$0 sm:$0xff] }
 0x1be   : > { %v791_v35 = vpack.c.bf16 %v751_v33, %v749_v32  ;;  %v665_v36 = vpop.f32.mrb[48].mxu0 }
 0x1bf   : > { %v666_v37 = vadd.f32 %v665_v36, %v1971_v54  ;;  %v667_v38 = vpop.f32.mrb[49].mxu0 }
 0x1c0   : > { %v668_v39 = vadd.f32 %v667_v38, %v1973_v55  ;;  %v669_v40 = vpop.f32.mrb[50].mxu0  ;;  %1055 = vmatprep.mubr.bf16.mxu1 %v791_v35 }
 0x1c1   : > { %v670_v41 = vadd.f32 %v669_v40, %v1971_v54  ;;  %v671_v42 = vpop.f32.mrb[51].mxu0  ;;  %1056 = vmatmul.mubr.bf16.gmra.mrb[44].mxu1 %v790_v34  ;;  %v752_v44 = vmax.f32 %v666_v37, 0.0 }
 0x1c2   : > { %v672_v43 = vadd.f32 %v671_v42, %v1973_v55  ;;  %v753_v46 = vmax.f32 %v668_v39, 0.0 }
 0x1c3   : > { %v754_v45 = vmax.f32 %v670_v41, 0.0 }
 0x1c4   : > { %v755_v47 = vmax.f32 %v672_v43, 0.0 }
 0x1c5   : > { %v792_v48 = vpack.c.bf16 %v754_v45, %v752_v44 }
 0x1c6   : > { %v793_v49 = vpack.c.bf16 %v755_v47, %v753_v46  ;;  %v675_v50 = vpop.f32.mrb[52].mxu0 }
 0x1c7   : > { %v676_v51 = vadd.f32 %v675_v50, %v1971_v54  ;;  %v677_v52 = vpop.f32.mrb[53].mxu0 }
 0x1c8   : > { %v678_v53 = vadd.f32 %v677_v52, %v1973_v55  ;;  %v679_v56 = vpop.f32.mrb[54].mxu0  ;;  %1063 = vmatprep.mubr.bf16.mxu1 %v793_v49 }
 0x1c9   : > { %v680_v57 = vadd.f32 %v679_v56, %v1971_v54  ;;  %v681_v58 = vpop.f32.mrb[55].mxu0  ;;  %1064 = vmatmul.mubr.bf16.gmra.mrb[48].mxu1 %v792_v48  ;;  %v756_v60 = vmax.f32 %v676_v51, 0.0 }
 0x1ca   : > { %v682_v59 = vadd.f32 %v681_v58, %v1973_v55  ;;  %v757_v62 = vmax.f32 %v678_v53, 0.0 }
 0x1cb   : > { %v758_v61 = vmax.f32 %v680_v57, 0.0 }
 0x1cc   : > { %v759_v63 = vmax.f32 %v682_v59, 0.0 }
 0x1cd   : > { %v794_v0 = vpack.c.bf16 %v758_v61, %v756_v60 }
 0x1ce   : > { %v795_v1 = vpack.c.bf16 %v759_v63, %v757_v62  ;;  %v685_v2 = vpop.f32.mrb[56].mxu0 }
 0x1cf   : > { %v686_v3 = vadd.f32 %v685_v2, %v1971_v54  ;;  %v687_v4 = vpop.f32.mrb[57].mxu0 }
 0x1d0   : > { %v688_v5 = vadd.f32 %v687_v4, %v1973_v55  ;;  %v689_v6 = vpop.f32.mrb[58].mxu0  ;;  %1071 = vmatprep.mubr.bf16.mxu1 %v795_v1 }
 0x1d1   : > { %v690_v7 = vadd.f32 %v689_v6, %v1971_v54  ;;  %v691_v8 = vpop.f32.mrb[59].mxu0  ;;  %1072 = vmatmul.mubr.bf16.gmra.mrb[52].mxu1 %v794_v0  ;;  %v760_v10 = vmax.f32 %v686_v3, 0.0 }
 0x1d2   : > { %v692_v9 = vadd.f32 %v691_v8, %v1973_v55  ;;  %v761_v12 = vmax.f32 %v688_v5, 0.0 }
 0x1d3   : > { %v762_v11 = vmax.f32 %v690_v7, 0.0 }
 0x1d4   : > { %v763_v13 = vmax.f32 %v692_v9, 0.0 }
 0x1d5   : > { %v796_v14 = vpack.c.bf16 %v762_v11, %v760_v10 }
 0x1d6   : > { %v797_v15 = vpack.c.bf16 %v763_v13, %v761_v12  ;;  %v695_v16 = vpop.f32.mrb[60].mxu0 }
 0x1d7   : > { %v696_v17 = vadd.f32 %v695_v16, %v1971_v54  ;;  %v697_v18 = vpop.f32.mrb[61].mxu0 }
 0x1d8   : > { %v698_v19 = vadd.f32 %v697_v18, %v1973_v55  ;;  %v699_v20 = vpop.f32.mrb[62].mxu0  ;;  %1079 = vmatprep.mubr.bf16.mxu1 %v797_v15 }
 0x1d9   : > { %v700_v21 = vadd.f32 %v699_v20, %v1971_v54  ;;  %v701_v22 = vpop.f32.mrb[63].mxu0  ;;  %1080 = vmatmul.mubr.bf16.gmra.mrb[56].mxu1 %v796_v14  ;;  %v764_v24 = vmax.f32 %v696_v17, 0.0 }
 0x1da   : > { %v702_v23 = vadd.f32 %v701_v22, %v1973_v55  ;;  %v765_v26 = vmax.f32 %v698_v19, 0.0 }
 0x1db   : > { %v766_v25 = vmax.f32 %v700_v21, 0.0 }
 0x1dc   : > { %v767_v27 = vmax.f32 %v702_v23, 0.0 }
 0x1dd   : > { %v798_v28 = vpack.c.bf16 %v766_v25, %v764_v24 }
 0x1de   : > { %v799_v29 = vpack.c.bf16 %v767_v27, %v765_v26 }
 0x1e0   : > { %1087 = vmatprep.mubr.bf16.mxu1 %v799_v29 }
 0x1e1   : > { %1088 = vmatmul.mubr.bf16.gmra.mrb[60].mxu1 %v798_v28 }
 0x23c   : > { %v1319_v30 = vpop.f32.mrb[0].mxu1 }
 0x23d   : > { %v1320_v54 = vpop.f32.mrb[1].mxu1 }
 0x23e   : > { %v1321_v32 = vadd.f32 %v1320_v54, %v1319_v30  ;;  %v1322_v33 = vpop.f32.mrb[2].mxu1 }
 0x23f   : > { %v1323_v34 = vpop.f32.mrb[3].mxu1 }
 0x240   : > { %v970_v55 = vadd.f32 %v1321_v32, %v2043_v31  ;;  %v1324_v35 = vadd.f32 %v1323_v34, %v1322_v33 }
 0x242   : > { %1096 = vst [vmem:[%s2046_s28] sm:$0xff] %v970_v55  ;;  %v973_v36 = vadd.f32 %v1324_v35, %v2043_v31 }
 0x244   : > { %1097 = vst [vmem:[%s2046_s28 + $0x8] sm:$0xff] %v973_v36  ;;  %v1325_v37 = vpop.f32.mrb[4].mxu1 }
 0x245   : > { %v1326_v38 = vpop.f32.mrb[5].mxu1 }
 0x246   : > { %v1327_v39 = vadd.f32 %v1326_v38, %v1325_v37  ;;  %v1328_v40 = vpop.f32.mrb[6].mxu1 }
 0x247   : > { %v1329_v41 = vpop.f32.mrb[7].mxu1 }
 0x248   : > { %v978_v42 = vadd.f32 %v1327_v39, %v2043_v31  ;;  %v1330_v43 = vadd.f32 %v1329_v41, %v1328_v40 }
 0x24a   : > { %1098 = vst [vmem:[%s2046_s28 + $0x10] sm:$0xff] %v978_v42  ;;  %v981_v44 = vadd.f32 %v1330_v43, %v2043_v31 }
 0x24c   : > { %1099 = vst [vmem:[%s2046_s28 + $0x18] sm:$0xff] %v981_v44  ;;  %v1331_v45 = vpop.f32.mrb[8].mxu1 }
 0x24d   : > { %v1332_v46 = vpop.f32.mrb[9].mxu1 }
 0x24e   : > { %v1333_v47 = vadd.f32 %v1332_v46, %v1331_v45  ;;  %v1334_v48 = vpop.f32.mrb[10].mxu1 }
 0x24f   : > { %v1335_v49 = vpop.f32.mrb[11].mxu1 }
 0x250   : > { %v986_v50 = vadd.f32 %v1333_v47, %v2043_v31  ;;  %v1336_v51 = vadd.f32 %v1335_v49, %v1334_v48 }
 0x252   : > { %1100 = vst [vmem:[%s2046_s28 + $0x20] sm:$0xff] %v986_v50  ;;  %v989_v52 = vadd.f32 %v1336_v51, %v2043_v31 }
 0x254   : > { %1101 = vst [vmem:[%s2046_s28 + $0x28] sm:$0xff] %v989_v52  ;;  %v1337_v53 = vpop.f32.mrb[12].mxu1 }
 0x255   : > { %v1338_v56 = vpop.f32.mrb[13].mxu1 }
 0x256   : > { %v1339_v57 = vadd.f32 %v1338_v56, %v1337_v53  ;;  %v1340_v58 = vpop.f32.mrb[14].mxu1 }
 0x257   : > { %v1341_v59 = vpop.f32.mrb[15].mxu1 }
 0x258   : > { %v994_v60 = vadd.f32 %v1339_v57, %v2043_v31  ;;  %v1342_v61 = vadd.f32 %v1341_v59, %v1340_v58 }
 0x25a   : > { %1102 = vst [vmem:[%s2046_s28 + $0x30] sm:$0xff] %v994_v60  ;;  %v997_v62 = vadd.f32 %v1342_v61, %v2043_v31 }
 0x25c   : > { %1103 = vst [vmem:[%s2046_s28 + $0x38] sm:$0xff] %v997_v62  ;;  %v1343_v63 = vpop.f32.mrb[16].mxu1 }
 0x25d   : > { %v1344_v0 = vpop.f32.mrb[17].mxu1 }
 0x25e   : > { %v1345_v1 = vadd.f32 %v1344_v0, %v1343_v63  ;;  %v1346_v2 = vpop.f32.mrb[18].mxu1 }
 0x25f   : > { %v1347_v3 = vpop.f32.mrb[19].mxu1 }
 0x260   : > { %v1002_v4 = vadd.f32 %v1345_v1, %v2043_v31  ;;  %v1348_v5 = vadd.f32 %v1347_v3, %v1346_v2 }
 0x262   : > { %1104 = vst [vmem:[%s2046_s28 + $0x40] sm:$0xff] %v1002_v4  ;;  %v1005_v6 = vadd.f32 %v1348_v5, %v2043_v31 }
 0x264   : > { %1105 = vst [vmem:[%s2046_s28 + $0x48] sm:$0xff] %v1005_v6  ;;  %v1349_v7 = vpop.f32.mrb[20].mxu1 }
 0x265   : > { %v1350_v8 = vpop.f32.mrb[21].mxu1 }
 0x266   : > { %v1351_v9 = vadd.f32 %v1350_v8, %v1349_v7  ;;  %v1352_v10 = vpop.f32.mrb[22].mxu1 }
 0x267   : > { %v1353_v11 = vpop.f32.mrb[23].mxu1 }
 0x268   : > { %v1010_v12 = vadd.f32 %v1351_v9, %v2043_v31  ;;  %v1354_v13 = vadd.f32 %v1353_v11, %v1352_v10 }
 0x26a   : > { %1106 = vst [vmem:[%s2046_s28 + $0x50] sm:$0xff] %v1010_v12  ;;  %v1013_v14 = vadd.f32 %v1354_v13, %v2043_v31 }
 0x26c   : > { %1107 = vst [vmem:[%s2046_s28 + $0x58] sm:$0xff] %v1013_v14  ;;  %v1355_v15 = vpop.f32.mrb[24].mxu1 }
 0x26d   : > { %v1356_v16 = vpop.f32.mrb[25].mxu1 }
 0x26e   : > { %v1357_v17 = vadd.f32 %v1356_v16, %v1355_v15  ;;  %v1358_v18 = vpop.f32.mrb[26].mxu1 }
 0x26f   : > { %v1359_v19 = vpop.f32.mrb[27].mxu1 }
 0x270   : > { %v1018_v20 = vadd.f32 %v1357_v17, %v2043_v31  ;;  %v1360_v21 = vadd.f32 %v1359_v19, %v1358_v18 }
 0x272   : > { %1108 = vst [vmem:[%s2046_s28 + $0x60] sm:$0xff] %v1018_v20  ;;  %v1021_v22 = vadd.f32 %v1360_v21, %v2043_v31 }
 0x274   : > { %1109 = vst [vmem:[%s2046_s28 + $0x68] sm:$0xff] %v1021_v22  ;;  %v1361_v23 = vpop.f32.mrb[28].mxu1 }
 0x275   : > { %v1362_v24 = vpop.f32.mrb[29].mxu1 }
 0x276   : > { %v1363_v25 = vadd.f32 %v1362_v24, %v1361_v23  ;;  %v1364_v26 = vpop.f32.mrb[30].mxu1 }
 0x277   : > { %v1365_v27 = vpop.f32.mrb[31].mxu1 }
 0x278   : > { %v1026_v28 = vadd.f32 %v1363_v25, %v2043_v31  ;;  %v1366_v29 = vadd.f32 %v1365_v27, %v1364_v26 }
 0x27a   : > { %1110 = vst [vmem:[%s2046_s28 + $0x70] sm:$0xff] %v1026_v28  ;;  %v1029_v30 = vadd.f32 %v1366_v29, %v2043_v31 }
 0x27c   : > { %1111 = vst [vmem:[%s2046_s28 + $0x78] sm:$0xff] %v1029_v30  ;;  %v1367_v54 = vpop.f32.mrb[32].mxu1 }
 0x27d   : > { %v1368_v32 = vpop.f32.mrb[33].mxu1 }
 0x27e   : > { %v1369_v33 = vadd.f32 %v1368_v32, %v1367_v54  ;;  %v1370_v34 = vpop.f32.mrb[34].mxu1 }
 0x27f   : > { %v1371_v55 = vpop.f32.mrb[35].mxu1 }
 0x280   : > { %v1034_v35 = vadd.f32 %v1369_v33, %v2043_v31  ;;  %v1372_v36 = vadd.f32 %v1371_v55, %v1370_v34 }
 0x282   : > { %1112 = vst [vmem:[%s2046_s28 + $0x80] sm:$0xff] %v1034_v35  ;;  %v1037_v37 = vadd.f32 %v1372_v36, %v2043_v31 }
 0x284   : > { %1113 = vst [vmem:[%s2046_s28 + $0x88] sm:$0xff] %v1037_v37  ;;  %v1373_v38 = vpop.f32.mrb[36].mxu1 }
 0x285   : > { %v1374_v39 = vpop.f32.mrb[37].mxu1 }
 0x286   : > { %v1375_v40 = vadd.f32 %v1374_v39, %v1373_v38  ;;  %v1376_v41 = vpop.f32.mrb[38].mxu1 }
 0x287   : > { %v1377_v42 = vpop.f32.mrb[39].mxu1 }
 0x288   : > { %v1042_v43 = vadd.f32 %v1375_v40, %v2043_v31  ;;  %v1378_v44 = vadd.f32 %v1377_v42, %v1376_v41 }
 0x28a   : > { %1114 = vst [vmem:[%s2046_s28 + $0x90] sm:$0xff] %v1042_v43  ;;  %v1045_v45 = vadd.f32 %v1378_v44, %v2043_v31 }
 0x28c   : > { %1115 = vst [vmem:[%s2046_s28 + $0x98] sm:$0xff] %v1045_v45  ;;  %v1379_v46 = vpop.f32.mrb[40].mxu1 }
 0x28d   : > { %v1380_v47 = vpop.f32.mrb[41].mxu1 }
 0x28e   : > { %v1381_v48 = vadd.f32 %v1380_v47, %v1379_v46  ;;  %v1382_v49 = vpop.f32.mrb[42].mxu1 }
 0x28f   : > { %v1383_v50 = vpop.f32.mrb[43].mxu1 }
 0x290   : > { %v1050_v51 = vadd.f32 %v1381_v48, %v2043_v31  ;;  %v1384_v52 = vadd.f32 %v1383_v50, %v1382_v49 }
 0x292   : > { %1116 = vst [vmem:[%s2046_s28 + $0xa0] sm:$0xff] %v1050_v51  ;;  %v1053_v53 = vadd.f32 %v1384_v52, %v2043_v31 }
 0x294   : > { %1117 = vst [vmem:[%s2046_s28 + $0xa8] sm:$0xff] %v1053_v53  ;;  %v1385_v56 = vpop.f32.mrb[44].mxu1 }
 0x295   : > { %v1386_v57 = vpop.f32.mrb[45].mxu1 }
 0x296   : > { %v1387_v58 = vadd.f32 %v1386_v57, %v1385_v56  ;;  %v1388_v59 = vpop.f32.mrb[46].mxu1 }
 0x297   : > { %v1389_v60 = vpop.f32.mrb[47].mxu1 }
 0x298   : > { %v1058_v61 = vadd.f32 %v1387_v58, %v2043_v31  ;;  %v1390_v62 = vadd.f32 %v1389_v60, %v1388_v59 }
 0x29a   : > { %1118 = vst [vmem:[%s2046_s28 + $0xb0] sm:$0xff] %v1058_v61  ;;  %v1061_v63 = vadd.f32 %v1390_v62, %v2043_v31 }
 0x29c   : > { %1119 = vst [vmem:[%s2046_s28 + $0xb8] sm:$0xff] %v1061_v63  ;;  %v1391_v0 = vpop.f32.mrb[48].mxu1 }
 0x29d   : > { %v1392_v1 = vpop.f32.mrb[49].mxu1 }
 0x29e   : > { %v1393_v2 = vadd.f32 %v1392_v1, %v1391_v0  ;;  %v1394_v3 = vpop.f32.mrb[50].mxu1 }
 0x29f   : > { %v1395_v4 = vpop.f32.mrb[51].mxu1 }
 0x2a0   : > { %v1066_v5 = vadd.f32 %v1393_v2, %v2043_v31  ;;  %v1396_v6 = vadd.f32 %v1395_v4, %v1394_v3 }
 0x2a2   : > { %1120 = vst [vmem:[%s2046_s28 + $0xc0] sm:$0xff] %v1066_v5  ;;  %v1069_v7 = vadd.f32 %v1396_v6, %v2043_v31 }
 0x2a4   : > { %1121 = vst [vmem:[%s2046_s28 + $0xc8] sm:$0xff] %v1069_v7  ;;  %v1397_v8 = vpop.f32.mrb[52].mxu1 }
 0x2a5   : > { %v1398_v9 = vpop.f32.mrb[53].mxu1 }
 0x2a6   : > { %v1399_v10 = vadd.f32 %v1398_v9, %v1397_v8  ;;  %v1400_v11 = vpop.f32.mrb[54].mxu1 }
 0x2a7   : > { %v1401_v12 = vpop.f32.mrb[55].mxu1 }
 0x2a8   : > { %v1074_v13 = vadd.f32 %v1399_v10, %v2043_v31  ;;  %v1402_v14 = vadd.f32 %v1401_v12, %v1400_v11 }
 0x2aa   : > { %1122 = vst [vmem:[%s2046_s28 + $0xd0] sm:$0xff] %v1074_v13  ;;  %v1077_v15 = vadd.f32 %v1402_v14, %v2043_v31 }
 0x2ac   : > { %1123 = vst [vmem:[%s2046_s28 + $0xd8] sm:$0xff] %v1077_v15  ;;  %v1403_v16 = vpop.f32.mrb[56].mxu1 }
 0x2ad   : > { %v1404_v17 = vpop.f32.mrb[57].mxu1 }
 0x2ae   : > { %v1405_v18 = vadd.f32 %v1404_v17, %v1403_v16  ;;  %v1406_v19 = vpop.f32.mrb[58].mxu1 }
 0x2af   : > { %v1407_v20 = vpop.f32.mrb[59].mxu1 }
 0x2b0   : > { %v1082_v21 = vadd.f32 %v1405_v18, %v2043_v31  ;;  %v1408_v22 = vadd.f32 %v1407_v20, %v1406_v19 }
 0x2b2   : > { %1124 = vst [vmem:[%s2046_s28 + $0xe0] sm:$0xff] %v1082_v21  ;;  %v1085_v23 = vadd.f32 %v1408_v22, %v2043_v31 }
 0x2b4   : > { %1125 = vst [vmem:[%s2046_s28 + $0xe8] sm:$0xff] %v1085_v23  ;;  %v1409_v24 = vpop.f32.mrb[60].mxu1 }
 0x2b5   : > { %v1410_v25 = vpop.f32.mrb[61].mxu1 }
 0x2b6   : > { %v1411_v26 = vadd.f32 %v1410_v25, %v1409_v24  ;;  %v1412_v27 = vpop.f32.mrb[62].mxu1 }
 0x2b7   : > { %v1413_v28 = vpop.f32.mrb[63].mxu1 }
 0x2b8   : > { %v1090_v29 = vadd.f32 %v1411_v26, %v2043_v31  ;;  %v1414_v30 = vadd.f32 %v1413_v28, %v1412_v27 }
 0x2ba   : > { %1126 = vst [vmem:[%s2046_s28 + $0xf0] sm:$0xff] %v1090_v29  ;;  %v1093_v54 = vadd.f32 %v1414_v30, %v2043_v31 }
 0x2bc   : > { %1127 = vst [vmem:[%s2046_s28 + $0xf8] sm:$0xff] %v1093_v54 }
 0x2bd   : > { %1644 = shalt.err (!%p1641_p2)
}
 0x2be   : > { %s1645_s24 = scalar_lea.hbm %s2113_s23, 4096  ;;  %s1649_s13 = scalar_lea.hbm %s2167_s5, 8192 }
 0x2bf   : > { %p1646_p13 = scmp.ne.s32.totalorder %s2113_s23, %s1645_s24  ;;  %p1650_p4 = scmp.lt.u32.totalorder %s2113_s23, %s2167_s5 }
 0x2c0   : > { %p1651_p7 = scmp.lt.u32.totalorder %s1649_s13, %s1645_s24  ;;  %p1653_p11 = scmp.lt.u32.totalorder %s1645_s24, %s2113_s23 }
 0x2c1   : > { %p1647_p6 = pnand %p1646_p13, %p2181_p0 }
 0x2c2   : > { %p1652_p8 = por %p1651_p7, %p1650_p4 }
 0x2c3   : > { %p1648_p10 = pneg %p1647_p6 }
 0x2c4   : > { %p1654_p1 = por %p1653_p11, %p1652_p8 }
 0x2c6   : > { %p1655_p3 = pnand %p1654_p1, %p1648_p10 }
 0x2c8   : > { %1658 = shalt.err (!%p1655_p3)
}
 0x2c9   : > { %s1712_s14 = smov 128   ;;  %s1713_s30 = smov 8  }
 0x2ca   : > { %1425 = dma.vmem_to_hbm [thread:$0]  (%p2181_p0), %s2115_s15, 4096, %s2113_s23, %s1129_s22, %s1712_s14, %s1712_s14, %s1713_s30  }
 0x2cb PF: > { %s1157_s11 = sand.u32 1, %s1689_s18   ;;  %p2182_p5 = scmp.ne.s32.totalorder %s2172_s25, 0 }
 0x2cc   : > { %p2183_p9 = scmp.ge.s32.totalorder %s1701_s21, 2  ;;  %s1158_s7 = scalar_lea.sflag [#allocation4], %s1157_s11 }
 0x2ce   : > { %p1439_p12 = pnand %p2183_p9, %p2182_p5 }
 0x2d0   : > { %1684 = dma.done.wait (!%p1439_p12), %s1158_s7, 4096  }
 0x2d1   : > { %1686 = vsyncadd (!%p1439_p12), %s1158_s7, 4294963200  ;;  %p19_p2 = scmp.ge.s32.totalorder %s1857_s16, 4   ;;  %s2184_s18 = smov %s1693_s19 }
 0x2d2   : > { %s2185_s19 = smov %s1697_s20  ;;  %s2186_s20 = smov %s1866_s27 }
 0x2d3   : > { %s2187_s21 = smov %s1857_s16  ;;  %21 = sbr.rel (!%p19_p2) target bundleno = 6 (0x6), region = 93 }
 0x2da   :  { %1163 = vsyncpa [#allocation3], 1 }
 0x2db   :  { %1165 = vsyncpa [#allocation3 + $0x1], 1 }
 0x2dc   :  { %1166 = vsyncpa [#allocation6], 1 }
 0x2dd   :  { %1167 = vsyncpa [#allocation4], 1 }
 0x2de   :  { %1169 = vsyncpa [#allocation4 + $0x1], 1 }

</bundles_post_ra>
